<compile_context>
chip_gen: v5e
topology: v5e:2x2
jax: 0.10.0
libtpu: 0.0.40
codegen_flags: <defaults>
</compile_context>

<pallas_src>
from functools import partial

import numpy as np
import jax
import jax.numpy as jnp
from jax.experimental import pallas as pl
from jax.experimental.pallas import tpu as pltpu


def _round_up(x, m):
    return (x + m - 1) // m * m


# --------------------------------------------------------------------------
# Fast path: x2 == 0  ->  res = histogram(lin) = one_hot(yp) @ one_hot(y)^T
# --------------------------------------------------------------------------
def _confusion_fast_kernel(yp_ref, y_ref, res_ref, *, n_classes):
    # yp_ref : (1, 1, TN)  int32   (lane-oriented)
    # y_ref  : (1, TN, 1)  int32   (sublane-oriented)
    # res_ref: (1, C, C)   float32 (resident accumulator across the N axis)
    C = n_classes
    TN = yp_ref.shape[-1]

    @pl.when(pl.program_id(1) == 0)
    def _init():
        res_ref[...] = jnp.zeros_like(res_ref)

    yp = yp_ref[0]                                               # (1, TN)
    y = y_ref[0]                                                 # (TN, 1)

    # One-hot encodings.  Padding uses yp == n_classes (out of range), which
    # produces an all-zero column and therefore contributes nothing.
    oh_yp = (jax.lax.broadcasted_iota(jnp.int32, (C, TN), 0) == yp)
    oh_y = (jax.lax.broadcasted_iota(jnp.int32, (TN, C), 1) == y)

    contrib = jnp.dot(oh_yp.astype(jnp.bfloat16),
                      oh_y.astype(jnp.bfloat16),
                      preferred_element_type=jnp.float32)        # (C, C)
    res_ref[0] += contrib


def _confusion_fast(yp, y, n_classes):
    B, N = yp.shape
    C = n_classes

    TN = min(512, _round_up(N, 128))        # lane-aligned tile of N
    N_pad = _round_up(N, TN)
    pad = N_pad - N

    yp_i = yp.astype(jnp.int32)
    y_i = y.astype(jnp.int32)
    if pad:
        # yp padded with an out-of-range class so padding never counts.
        yp_i = jnp.pad(yp_i, ((0, 0), (0, pad)), constant_values=n_classes)
        y_i = jnp.pad(y_i, ((0, 0), (0, pad)), constant_values=0)

    yp3 = yp_i.reshape(B, 1, N_pad)
    y3 = y_i.reshape(B, N_pad, 1)
    n_kn = N_pad // TN

    return pl.pallas_call(
        partial(_confusion_fast_kernel, n_classes=C),
        out_shape=jax.ShapeDtypeStruct((B, C, C), jnp.float32),
        grid=(B, n_kn),
        in_specs=[
            pl.BlockSpec((1, 1, TN), lambda i, k: (i, 0, k)),
            pl.BlockSpec((1, TN, 1), lambda i, k: (i, k, 0)),
        ],
        out_specs=pl.BlockSpec((1, C, C), lambda i, k: (i, 0, 0)),
        compiler_params=pltpu.CompilerParams(
            dimension_semantics=("parallel", "arbitrary")),
    )(yp3, y3)


# --------------------------------------------------------------------------
# General path: arbitrary x2 (exact torch scatter_ + row-sum semantics)
# --------------------------------------------------------------------------
def _confusion_x2_kernel(packed_ref, x2_ref, res_ref, *, n_classes):
    # packed_ref: (1, 2, TN)   int32   [yp; y] packed -> one DMA stream
    # x2_ref    : (1, C2, TN)  float32
    # res_ref   : (1, C2, 1)   float32 (resident accumulator across N axis)
    C2 = n_classes * n_classes
    TN = x2_ref.shape[-1]

    @pl.when(pl.program_id(1) == 0)
    def _init():
        res_ref[...] = jnp.zeros_like(res_ref)

    packed = packed_ref[0]                                       # (2, TN)
    yp = packed[0:1, :]                                          # (1, TN)
    y = packed[1:2, :]                                           # (1, TN)
    lin = yp * n_classes + y                                     # (1, TN)

    rows = jax.lax.broadcasted_iota(jnp.int32, (C2, TN), 0)      # (C2, TN)
    hit = rows == lin                                            # (C2, TN)
    # scatter_(0, lin, 1): positions (lin[k], k) become 1, others keep x2.
    # Padding columns have lin >= C2 (no hit) and x2 == 0 -> contribute 0.
    x2_new = jnp.where(hit, jnp.float32(1.0), x2_ref[0])         # (C2, TN)
    res_ref[0] += jnp.sum(x2_new, axis=-1, keepdims=True)        # (C2, 1)


def _confusion_with_x2(yp, y, x2, n_classes):
    B, N = yp.shape
    C = n_classes
    C2 = C * C

    # Cap the N tile so the double-buffered x2 tile stays well inside VMEM on
    # every generation (v7x has only 64 MiB physical / 32 MiB scoped default):
    # per-buffer budget 8 MiB -> <= 16 MiB of x2 double-buffering.
    budget_bytes = 8 * 1024 * 1024
    tn_cap = max(128, (budget_bytes // (C2 * 4)) // 128 * 128)
    TN = min(512, tn_cap)
    if N <= TN:
        TN = N                     # full-extent block (no padding needed)
        N_pad = N
    else:
        N_pad = _round_up(N, TN)
    pad = N_pad - N

    yp_i = yp.astype(jnp.int32)
    y_i = y.astype(jnp.int32)
    x2_f = x2.astype(jnp.float32)
    if pad:
        yp_i = jnp.pad(yp_i, ((0, 0), (0, pad)), constant_values=n_classes)
        y_i = jnp.pad(y_i, ((0, 0), (0, pad)), constant_values=0)
        x2_f = jnp.pad(x2_f, ((0, 0), (0, 0), (0, pad)))

    packed = jnp.stack([yp_i, y_i], axis=1)                      # (B, 2, N_pad)
    n_kn = N_pad // TN

    out = pl.pallas_call(
        partial(_confusion_x2_kernel, n_classes=C),
        out_shape=jax.ShapeDtypeStruct((B, C2, 1), jnp.float32),
        grid=(B, n_kn),
        in_specs=[
            pl.BlockSpec((1, 2, TN), lambda i, k: (i, 0, k)),
            pl.BlockSpec((1, C2, TN), lambda i, k: (i, 0, k)),
        ],
        out_specs=pl.BlockSpec((1, C2, 1), lambda i, k: (i, 0, 0)),
        compiler_params=pltpu.CompilerParams(
            dimension_semantics=("parallel", "arbitrary")),
    )(packed, x2_f)

    return out.reshape(B, C, C)


def confusion_matrix(yp, y, x2=None, *, n_classes):
    """yp, y: (B, ...) integer class ids; x2: optional (B, n_classes**2, N)
    float scatter target (pass None when it is all zeros -> fast path).
    Returns res: (B, n_classes, n_classes) float32."""
    B = yp.shape[0]
    yp2 = yp.reshape(B, -1)
    y2 = y.reshape(B, -1)
    if x2 is None:
        return _confusion_fast(yp2, y2, n_classes)
    return _confusion_with_x2(yp2, y2, x2, n_classes)


if __name__ == "__main__":
    n_classes = 4
    B, N = 2, 8
    C2 = n_classes * n_classes

    key = jax.random.PRNGKey(0)
    k1, k2, k3 = jax.random.split(key, 3)
    yp = jax.random.randint(k1, (B, N), 0, n_classes, dtype=jnp.int32)
    y = jax.random.randint(k2, (B, N), 0, n_classes, dtype=jnp.int32)
    # Nonzero scatter target to exercise the general (x2-reading) path.
    x2 = jax.random.bernoulli(k3, 0.3, (B, C2, N)).astype(jnp.float32)

    # Fast path: x2 all zeros -> histogram-only MXU kernel (no x2 HBM stream).
    res_fast = jax.block_until_ready(
        confusion_matrix(yp, y, None, n_classes=n_classes))
    # General path: arbitrary x2, exact torch scatter_ + row-sum semantics.
    res_gen = jax.block_until_ready(
        confusion_matrix(yp, y, x2, n_classes=n_classes))

    # Quiet numpy reference (torch semantics).
    def ref_conf(yp_np, y_np, x2_np):
        Bn, Nn = yp_np.shape
        out = np.zeros((Bn, n_classes, n_classes), dtype=np.float32)
        for i in range(Bn):
            lin = yp_np[i] * n_classes + y_np[i]
            x2i = x2_np[i].copy()
            x2i[lin, np.arange(Nn)] = 1.0
            out[i] = x2i.sum(axis=1).reshape(n_classes, n_classes)
        return out

    yp_np, y_np = np.asarray(yp), np.asarray(y)
    ref_fast = ref_conf(yp_np, y_np, np.zeros((B, C2, N), np.float32))
    ref_gen = ref_conf(yp_np, y_np, np.asarray(x2))
    np.testing.assert_allclose(np.asarray(res_fast), ref_fast, rtol=0, atol=0)
    np.testing.assert_allclose(np.asarray(res_gen), ref_gen, rtol=0, atol=0)

    print("KERNEL_OK")
</pallas_src>

<mosaic_0001>
module attributes {stable_mosaic.version = 11 : i64} {
  func.func @_confusion_fast_kernel(%arg0: i32, %arg1: i32, %arg2: memref<1x1x128xi32, #tpu.memory_space<vmem>>, %arg3: memref<1x128x1xi32, #tpu.memory_space<vmem>>, %arg4: memref<1x4x4xf32, #tpu.memory_space<vmem>>) attributes {dimension_semantics = [#tpu.dimension_semantics<parallel>, #tpu.dimension_semantics<arbitrary>], iteration_bounds = array<i64: 2, 1>, scalar_prefetch = 0 : i64, scratch_operands = 0 : i64, tpu.core_type = #tpu.core_type<tc>, window_params = [{transform_indices = @transform_0, window_bounds = array<i64: 1, 1, 128>}, {transform_indices = @transform_1, window_bounds = array<i64: 1, 128, 1>}, {transform_indices = @transform_2, window_bounds = array<i64: 1, 4, 4>}]} {
    %c0_i32 = arith.constant 0 : i32
    %0 = arith.cmpi eq, %arg1, %c0_i32 : i32
    %1 = arith.extui %0 : i1 to i32
    %c0_i32_0 = arith.constant 0 : i32
    %2 = arith.cmpi ne, %1, %c0_i32_0 : i32
    scf.if %2 {
      %cst_12 = arith.constant 0.000000e+00 : f32
      %26 = vector.broadcast %cst_12 : f32 to vector<1x4x4xf32>
      %c0_13 = arith.constant 0 : index
      %c0_14 = arith.constant 0 : index
      %c0_15 = arith.constant 0 : index
      %27 = vector.load %arg4[%c0_13, %c0_14, %c0_15] : memref<1x4x4xf32, #tpu.memory_space<vmem>>, vector<1x4x4xf32>
      tpu.vector_store %arg4[%c0_13, %c0_14, %c0_15], %26 {strides = array<i32>} : memref<1x4x4xf32, #tpu.memory_space<vmem>>, vector<1x4x4xf32>,
    } else {
    }
    %c0 = arith.constant 0 : index
    %c0_1 = arith.constant 0 : index
    %c0_2 = arith.constant 0 : index
    %3 = vector.load %arg2[%c0, %c0_1, %c0_2] : memref<1x1x128xi32, #tpu.memory_space<vmem>>, vector<1x1x128xi32>
    %4 = vector.shape_cast %3 : vector<1x1x128xi32> to vector<1x128xi32>
    %c0_3 = arith.constant 0 : index
    %c0_4 = arith.constant 0 : index
    %c0_5 = arith.constant 0 : index
    %5 = vector.load %arg3[%c0_3, %c0_4, %c0_5] : memref<1x128x1xi32, #tpu.memory_space<vmem>>, vector<1x128x1xi32>
    %6 = vector.shape_cast %5 : vector<1x128x1xi32> to vector<128x1xi32>
    %7 = tpu.iota {dimensions = array<i32: 0>} : vector<4x128xi32>
    %8 = vector.broadcast %4 : vector<1x128xi32> to vector<4x128xi32>
    %9 = arith.cmpi eq, %7, %8 : vector<4x128xi32>
    %10 = tpu.iota {dimensions = array<i32: 1>} : vector<128x4xi32>
    %11 = vector.broadcast %6 : vector<128x1xi32> to vector<128x4xi32>
    %12 = arith.cmpi eq, %10, %11 : vector<128x4xi32>
    %13 = arith.extui %9 : vector<4x128xi1> to vector<4x128xi32>
    %14 = arith.sitofp %13 : vector<4x128xi32> to vector<4x128xf32>
    %15 = arith.truncf %14 : vector<4x128xf32> to vector<4x128xbf16>
    %16 = arith.extui %12 : vector<128x4xi1> to vector<128x4xi32>
    %17 = arith.sitofp %16 : vector<128x4xi32> to vector<128x4xf32>
    %18 = arith.truncf %17 : vector<128x4xf32> to vector<128x4xbf16>
    %cst = arith.constant dense<0.000000e+00> : vector<4x4xf32>
    %19 = tpu.matmul %15, %18, %cst {dimension_numbers = #tpu.dot_dimension_numbers<[1], [0], [0], [1], [0, 0, 1, 1], [], []>} : vector<4x128xbf16>, vector<128x4xbf16>, vector<4x4xf32> -> vector<4x4xf32>
    %c0_6 = arith.constant 0 : index
    %c0_7 = arith.constant 0 : index
    %c0_8 = arith.constant 0 : index
    %20 = vector.load %arg4[%c0_6, %c0_7, %c0_8] : memref<1x4x4xf32, #tpu.memory_space<vmem>>, vector<1x4x4xf32>
    %21 = vector.shape_cast %20 : vector<1x4x4xf32> to vector<4x4xf32>
    %22 = arith.addf %21, %19 : vector<4x4xf32>
    %c0_9 = arith.constant 0 : index
    %c0_10 = arith.constant 0 : index
    %c0_11 = arith.constant 0 : index
    %23 = vector.load %arg4[%c0_9, %c0_10, %c0_11] : memref<1x4x4xf32, #tpu.memory_space<vmem>>, vector<1x4x4xf32>
    %24 = vector.shape_cast %23 : vector<1x4x4xf32> to vector<4x4xf32>
    %25 = vector.shape_cast %22 : vector<4x4xf32> to vector<1x4x4xf32>
    tpu.vector_store %arg4[%c0_9, %c0_10, %c0_11], %25 {strides = array<i32>} : memref<1x4x4xf32, #tpu.memory_space<vmem>>, vector<1x4x4xf32>,
    return
  }
  func.func @transform_0(%arg0: i32, %arg1: i32) -> (i32, i32, i32) {
    %c0_i32 = arith.constant 0 : i32
    %c0_i32_0 = arith.constant 0 : i32
    return %arg0, %c0_i32, %arg1 : i32, i32, i32
  }
  func.func @transform_1(%arg0: i32, %arg1: i32) -> (i32, i32, i32) {
    %c0_i32 = arith.constant 0 : i32
    %c0_i32_0 = arith.constant 0 : i32
    return %arg0, %arg1, %c0_i32 : i32, i32, i32
  }
  func.func @transform_2(%arg0: i32, %arg1: i32) -> (i32, i32, i32) {
    %c0_i32 = arith.constant 0 : i32
    %c0_i32_0 = arith.constant 0 : i32
    %c0_i32_1 = arith.constant 0 : i32
    return %arg0, %c0_i32, %c0_i32_0 : i32, i32, i32
  }
}

</mosaic_0001>

<bundles_post_ra>
// kernel: tpu_custom_call.1
= control target key start
LH: loop header
LB: loop body
LE: loop exit
PB: predicated region body
PF: predicated region fallthrough
CT: control target
= control target key end

     0   :  { %7 = vsyncpa [#allocation3], 0  ;;  %s796_s0 = inlined_call_operand.vmem [shape: s32[2,1,128], index: 0, kind: input, shape index: {}]   ;;  %s797_s1 = inlined_call_operand.vmem [shape: s32[2,128,1], index: 1, kind: input, shape index: {}]   ;;  %s798_s2 = inlined_call_operand.hbm [shape: f32[2,4,4], index: 2, kind: output, shape index: {}]  }
   0x1   :  { %9 = vsyncpa [#allocation3 + $0x1], 0  ;;  %s657_s9 = smov 0   ;;  %s659_s10 = smov 0  }
   0x2   :  { %s661_s11 = smov 0   ;;  %s663_s12 = smov 0  }
   0x3   :  { %s665_s13 = smov 0   ;;  %s667_s14 = smov 0  }
   0x4 LB: > { %s449_s15 = sadd.s32 4294967295, %s637_s14   ;;  %s450_s16 = sadd.s32 4294967294, %s637_s14   ;;  %s637_s14 = sphi %s667_s14, %s15_s14   ;;  %s633_s13 = sphi %s665_s13, %s805_s13   ;;  %s629_s12 = sphi %s663_s12, %s804_s12   ;;  %s625_s11 = sphi %s661_s11, %s803_s11   ;;  %s621_s10 = sphi %s659_s10, %s802_s10   ;;  %s617_s9 = sphi %s657_s9, %s801_s9  }
   0x5   : > { %s27_s17 = sadd.s32 1, %s633_s13  ;;  %s90_s18 = sadd.s32 1, %s625_s11 }
   0x6   : > { %p29_p0 = scmp.ge.s32.totalorder %s27_s17, 2  ;;  %p100_p1 = scmp.ne.s32.totalorder %s625_s11, %s621_s10 }
   0x7   : > { %p101_p2 = scmp.eq.s32.totalorder %s449_s15, 1  ;;  %p106_p3 = scmp.ne.s32.totalorder %s621_s10, %s617_s9 }
   0x8   : > { %s807_s17 = smov (%p29_p0, %s27_s17), 0  ;;  %p107_p5 = scmp.eq.s32.totalorder %s450_s16, 1 }
   0x9   : > { %p697_p4 = por %p101_p2, %p100_p1  ;;  %s87_s20 = ssub.s32 %s633_s13, %s807_s17 }
   0xa   : > { %p453_p6 = scmp.ge.s32.totalorder %s637_s14, 1  ;;  %p88_p7 = scmp.eq.s32.totalorder %s87_s20, 0 }
   0xb   : > { %p704_p8 = por %p107_p5, %p106_p3  ;;  %p147_p9 = scmp.lt.s32.totalorder %s637_s14, 3 }
   0xc   : > { %s710_s22 = scalar_select %p88_p7, %s625_s11, %s90_s18  }
   0xd   : > { %p148_p10 = pnand %p453_p6, %p147_p9 }
   0xe   : > { %p179_p11 = scmp.lt.s32.totalorder (!%p148_p10), %s629_s12, 1  ;;  %s176_s3 = sand.u32 (!%p148_p10), 1, %s621_s10  }
   0xf   : > { %151 = sbr.rel (%p148_p10) target bundleno = 319 (0x13f), region = 28  ;;  %s454_s4 = sshll.u32 (!%p148_p10), %s176_s3, 2 }
  0x10   : > { %s745_s5 = scalar_lea.vmem (!%p148_p10), [#allocation2], %s454_s4  ;;  %s493_s8 = sshll.u32 (!%p148_p10), %s629_s12, 2 }
  0x11   : > { %s359_s18 = scalar_lea.hbm (!%p148_p10), %s798_s2, %s493_s8  ;;  %s361_s20 = sshll.u32 (!%p148_p10), %s745_s5, 4  ;;  %s362_s20 = int_to_ptr.vmem [resolvable:$true] %s361_s20 }
  0x12   : > { %s579_s28 = scalar_lea.hbm (!%p148_p10), %s798_s2, 8 }
  0x14   : > { %v639_v0 = vmov 0   ;;  %s714_s23 = scalar_select %p179_p11, %s629_s12, 1  ;;  %v218_v20 = vlaneseq  ;;  %v640_v25 = vmov 1.0|1.0   ;;  %vm199_vm5 = vcmask 27648  }
  0x15   : > { %557 = vset.pattern.permute.xlu2 %v639_v0  ;;  %556 = vset.pattern.permute.xlu1 %v639_v0  ;;  %v641_v26 = vmov 0.0  }
  0x16   : > { %555 = vset.pattern.permute.xlu0 %v639_v0  ;;  %s496_s24 = sshll.u32 %s714_s23, 7  ;;  %s184_s30 = scalar_lea.vmem %s796_s0, %s714_s23  ;;  %v223_v21 = vand.u32 127, %v218_v20  ;;  %200 = vst.msk [vmem:[%s745_s5] sm:$0xf] %vm199_vm5, %v641_v26  ;;  %v219_v35 = vshrl.u32 %v218_v20, 7 }
  0x17   : > { %s720_s27 = scalar_lea.vmem %s797_s1, %s496_s24  ;;  %v558_v36 = vld [vmem:[%s184_s30] ss:$0 sm:$0xff]  ;;  %s363_s23 = sshll.u32 %s359_s18, 4  ;;  %s364_s23 = int_to_ptr.hbm [resolvable:$true] %s363_s23 }
  0x18   : > { %v216_v1 = vld [vmem:[%s720_s27 + $0x70] sm:$0xff]  ;;  %v214_v2 = vld [vmem:[%s720_s27 + $0x60] sm:$0xff]  ;;  %v217_v4 = vld [vmem:[%s720_s27 + $0x78] sm:$0xff]  ;;  %s349_s24 = scalar_lea.sflag [#allocation3], %s176_s3  ;;  %s573_s25 = sshra.s32 %s364_s23, 4  ;;  %s574_s25 = int_to_ptr.hbm [resolvable:$true] %s573_s25 }
  0x19   : > { %v212_v3 = vld [vmem:[%s720_s27 + $0x50] sm:$0xff]  ;;  %267 = vperm.xlu0 %555, %v216_v1   ;;  %261 = vperm.xlu1 %556, %v214_v2   ;;  %v215_v5 = vld [vmem:[%s720_s27 + $0x68] sm:$0xff]  ;;  %v213_v6 = vld [vmem:[%s720_s27 + $0x58] sm:$0xff]  ;;  %s575_s26 = scalar_lea.hbm %s574_s25, 4  ;;  %p580_p1 = scmp.lt.s32.totalorder %s574_s25, %s798_s2 }
  0x1a   : > { %255 = vperm.xlu2 %557, %v212_v3   ;;  %v211_v7 = vld [vmem:[%s720_s27 + $0x48] sm:$0xff]  ;;  %v210_v8 = vld [vmem:[%s720_s27 + $0x40] sm:$0xff]  ;;  %v208_v9 = vld [vmem:[%s720_s27 + $0x30] sm:$0xff]  ;;  %p576_p12 = scmp.ne.s32.totalorder %s574_s25, %s575_s26  ;;  %p581_p2 = scmp.lt.s32.totalorder %s579_s28, %s575_s26 }
  0x1b   : > { %v209_v10 = vld [vmem:[%s720_s27 + $0x38] sm:$0xff]  ;;  %v206_v11 = vld [vmem:[%s720_s27 + $0x20] sm:$0xff]  ;;  %v207_v12 = vld [vmem:[%s720_s27 + $0x28] sm:$0xff] }
  0x1c   : > { %v205_v13 = vld [vmem:[%s720_s27 + $0x18] sm:$0xff]  ;;  %v204_v14 = vld [vmem:[%s720_s27 + $0x10] sm:$0xff]  ;;  %v202_v15 = vld [vmem:[%s720_s27] sm:$0xff]  ;;  %p577_p13 = pnand %p576_p12, %p697_p4  ;;  %p582_p3 = por %p581_p2, %p580_p1 }
  0x1d   : > { %v203_v16 = vld [vmem:[%s720_s27 + $0x8] sm:$0xff]  ;;  %v344_v39 = vld [vmem:[%s745_s5] sm:$0xf] }
  0x1e   : > { %p578_p0 = pneg %p577_p13 }
  0x20   : > { %p583_p5 = pnand %p582_p3, %p578_p0 }
  0x21   : > { %270 = vperm.xlu0 %555, %v217_v4   ;;  %264 = vperm.xlu1 %556, %v215_v5  }
  0x22   : > { %258 = vperm.xlu2 %557, %v213_v6  }
  0x29   : > { %252 = vperm.xlu1 %556, %v211_v7   ;;  %249 = vperm.xlu0 %555, %v210_v8  }
  0x2a   : > { %243 = vperm.xlu2 %557, %v208_v9  }
  0x31   : > { %246 = vperm.xlu0 %555, %v209_v10   ;;  %237 = vperm.xlu1 %556, %v206_v11  }
  0x32   : > { %240 = vperm.xlu2 %557, %v207_v12  }
  0x39   : > { %234 = vperm.xlu1 %556, %v205_v13   ;;  %231 = vperm.xlu0 %555, %v204_v14  }
  0x3a   : > { %225 = vperm.xlu2 %557, %v202_v15  }
  0x41   : > { %228 = vperm.xlu0 %555, %v203_v16  }
  0x74   : > { %v256_v17 = vpop.permute.xlu2 %255 }
  0x75   : > { %vm282_vm7 = vcmp.eq.s32.totalorder %v223_v21, %v256_v17 }
  0x7c   : > { %v259_v22 = vpop.permute.xlu2 %258 }
  0x7d   : > { %vm283_vm8 = vcmp.eq.s32.totalorder %v223_v21, %v259_v22 }
  0x7e   : > { %vm478_vm9 = vmpackc.low %vm283_vm8, %vm282_vm7  ;;  %vm221_vm7 = vcmp.eq.s32.totalorder %v219_v35, %v558_v36 }
  0x84   : > { %v244_v29 = vpop.permute.xlu2 %243 }
  0x85   : > { %vm278_vm13 = vcmp.eq.s32.totalorder %v223_v21, %v244_v29 }
  0x8b   : > { %v268_v18 = vpop.permute.xlu0 %267  ;;  %v262_v19 = vpop.permute.xlu1 %261 }
  0x8c   : > { %vm286_vm1 = vcmp.eq.s32.totalorder %v223_v21, %v268_v18  ;;  %vm284_vm4 = vcmp.eq.s32.totalorder %v223_v21, %v262_v19  ;;  %v241_v32 = vpop.permute.xlu2 %240 }
  0x93   : > { %v271_v23 = vpop.permute.xlu0 %270  ;;  %v265_v24 = vpop.permute.xlu1 %264 }
  0x94   : > { %vm287_vm0 = vcmp.eq.s32.totalorder %v223_v21, %v271_v23  ;;  %vm285_vm3 = vcmp.eq.s32.totalorder %v223_v21, %v265_v24  ;;  %v226_v37 = vpop.permute.xlu2 %225 }
  0x95   : > { %vm474_vm2 = vmpackc.low %vm287_vm0, %vm286_vm1  ;;  %vm277_vm1 = vcmp.eq.s32.totalorder %v223_v21, %v241_v32  ;;  %vm272_vm8 = vcmp.eq.s32.totalorder %v223_v21, %v226_v37 }
  0x96   : > { %475 = vmatpush.bf16.msk.msra.mxu0 %vm474_vm2, %v640_v25  ;;  %vm476_vm6 = vmpackc.low %vm285_vm3, %vm284_vm4 }
  0x9a   : > { %477 = vmatpush.bf16.msk.msra.mxu0 %vm476_vm6, %v640_v25 }
  0x9b   : > { %v253_v27 = vpop.permute.xlu1 %252  ;;  %v250_v28 = vpop.permute.xlu0 %249 }
  0x9c   : > { %vm281_vm10 = vcmp.eq.s32.totalorder %v223_v21, %v253_v27  ;;  %vm280_vm11 = vcmp.eq.s32.totalorder %v223_v21, %v250_v28 }
  0x9d   : > { %vm480_vm12 = vmpackc.low %vm281_vm10, %vm280_vm11 }
  0x9e   : > { %479 = vmatpush.bf16.msk.msra.mxu0 %vm478_vm9, %v640_v25  ;;  %vm490_vm11 = vmpackc.low %vm221_vm7, %vm221_vm7 }
  0xa2   : > { %481 = vmatpush.bf16.msk.msra.mxu0 %vm480_vm12, %v640_v25 }
  0xa3   : > { %v247_v30 = vpop.permute.xlu0 %246  ;;  %v238_v31 = vpop.permute.xlu1 %237 }
  0xa4   : > { %vm279_vm14 = vcmp.eq.s32.totalorder %v223_v21, %v247_v30  ;;  %vm276_vm0 = vcmp.eq.s32.totalorder %v223_v21, %v238_v31 }
  0xa5   : > { %vm482_vm15 = vmpackc.low %vm279_vm14, %vm278_vm13 }
  0xa6   : > { %483 = vmatpush.bf16.msk.msra.mxu0 %vm482_vm15, %v640_v25  ;;  %vm484_vm2 = vmpackc.low %vm277_vm1, %vm276_vm0 }
  0xaa   : > { %485 = vmatpush.bf16.msk.msra.mxu0 %vm484_vm2, %v640_v25 }
  0xab   : > { %v235_v33 = vpop.permute.xlu1 %234  ;;  %v232_v34 = vpop.permute.xlu0 %231 }
  0xac   : > { %vm275_vm3 = vcmp.eq.s32.totalorder %v223_v21, %v235_v33  ;;  %vm274_vm4 = vcmp.eq.s32.totalorder %v223_v21, %v232_v34 }
  0xad   : > { %vm486_vm6 = vmpackc.low %vm275_vm3, %vm274_vm4 }
  0xae   : > { %487 = vmatpush.bf16.msk.msra.mxu0 %vm486_vm6, %v640_v25 }
  0xb3   : > { %v229_v38 = vpop.permute.xlu0 %228 }
  0xb4   : > { %vm273_vm9 = vcmp.eq.s32.totalorder %v223_v21, %v229_v38 }
  0xb5   : > { %vm488_vm10 = vmpackc.low %vm273_vm9, %vm272_vm8 }
  0xb6   : > { %489 = vmatpush.bf16.msk.msra.mxu0 %vm488_vm10, %v640_v25 }
  0xb9   : > { %491 = vmatmul.msk.bf16.vlgmr.msra.gmra.mxu0 %vm490_vm11, %v640_v25 }
 0x136   : > { %v340_v40 = vpop.f32.mrf.mxu0 }
 0x137   : > { %v345_v41 = vadd.f32 %v344_v39, %v340_v40 }
 0x139   : > { %347 = vst.msk [vmem:[%s745_s5] sm:$0xf] %vm199_vm5, %v345_v41 }
 0x13a   : > { %586 = shalt.err (!%p583_p5)
}
 0x13b   : > { %497 = dma.vmem_to_hbm [thread:$0]  (%p697_p4), %s362_s20, 64, %s364_s23, %s349_s24  }
 0x13e   : > { %v342_v42 = vpop.f32.mrf.mxu0 }
 0x13f PF: > { %p503_p6 = scmp.ge.s32.totalorder %s637_s14, 2  ;;  %s375_s3 = sand.u32 1, %s617_s9  }
 0x140   : > { %s376_s4 = scalar_lea.sflag [#allocation3], %s375_s3 }
 0x141   : > { %p500_p7 = pnand %p503_p6, %p704_p8 }
 0x143   : > { %p501_p9 = pneg %p500_p7 }
 0x145   : > { %612 = dma.done.wait (%p501_p9), %s376_s4, 64  }
 0x146   : > { %614 = vsyncadd (%p501_p9), %s376_s4, 4294967232  ;;  %s15_s14 = sadd.s32 1, %s637_s14   ;;  %s801_s9 = smov %s621_s10 }
 0x147   : > { %p12_p10 = scmp.ge.s32.totalorder %s15_s14, 4   ;;  %s802_s10 = smov %s625_s11 }
 0x148   : > { %s803_s11 = smov %s710_s22  ;;  %s804_s12 = smov %s633_s13 }
 0x149   : > { %s805_s13 = smov %s807_s17  ;;  %14 = sbr.rel (!%p12_p10) target bundleno = 4 (0x4), region = 70 }
 0x14e   :  { %382 = vsyncpa [#allocation3], 1 }
 0x14f   :  { %384 = vsyncpa [#allocation3 + $0x1], 1 }

</bundles_post_ra>
